<compile_context>
chip_gen: v5e
topology: v5e:2x2
jax: 0.10.0
libtpu: 0.0.40
codegen_flags: <defaults>
</compile_context>

<pallas_src>
import functools

import jax
import jax.numpy as jnp
from jax.experimental import pallas as pl
from jax.experimental.pallas import tpu as pltpu


def _ffn_kernel(x_ref, gamma_ref, beta_ref, w1_ref, b1_ref, w2_ref, b2_ref,
                o_ref, xn_ref, acc_ref, *, eps: float):
    # Grid: (row_tiles, hidden_chunks). Hidden axis is the trailing reduction.
    h_idx = pl.program_id(1)
    n_h = pl.num_programs(1)

    @pl.when(h_idx == 0)
    def _init():
        # LayerNorm over the embedding axis, f32 stats, single pass.
        x = x_ref[...].astype(jnp.float32)
        mean = jnp.mean(x, axis=-1, keepdims=True)
        var = jnp.mean(x * x, axis=-1, keepdims=True) - mean * mean
        xn = (x - mean) * jax.lax.rsqrt(var + eps)
        xn = xn * gamma_ref[...] + beta_ref[...]
        xn_ref[...] = xn.astype(xn_ref.dtype)          # bf16 matmul input
        acc_ref[...] = jnp.zeros_like(acc_ref)

    # Linear 1 chunk (E -> tile_h) + ReLU: bf16 MXU matmul, f32 accumulate.
    h = jnp.dot(xn_ref[...], w1_ref[...], preferred_element_type=jnp.float32)
    h = jnp.maximum(h + b1_ref[...], 0.0)

    # Linear 2 chunk (tile_h -> E), accumulated into the f32 scratch.
    acc_ref[...] += jnp.dot(h.astype(jnp.bfloat16), w2_ref[...],
                            preferred_element_type=jnp.float32)

    @pl.when(h_idx == n_h - 1)
    def _finalize():
        y = acc_ref[...] + b2_ref[...] + x_ref[...].astype(jnp.float32)
        o_ref[...] = y.astype(o_ref.dtype)


def _round_up(a: int, b: int) -> int:
    return (a + b - 1) // b * b


def feed_forward_layer(x, params, *, eps: float = 1e-5,
                       tile_m: int = 256, tile_h: int = 512):
    """x: (B, S, E) float32. params: dict of gamma, beta, w1, b1, w2, b2."""
    B, S, E = x.shape
    H = params["w1"].shape[1]
    M = B * S

    # Row tiling: big tiles keep the MXU fed; pad rows so any batch*seq works.
    tm = min(tile_m, _round_up(M, 8))
    M_pad = _round_up(M, tm)

    # Hidden (4E) chunking: bounds VMEM (v7x has only 64 MiB) at large tile_m.
    th = min(tile_h, _round_up(H, 128))
    H_pad = _round_up(H, th)

    x2d = x.reshape(M, E)
    if M_pad != M:
        x2d = jnp.pad(x2d, ((0, M_pad - M), (0, 0)))

    gamma = params["gamma"].reshape(1, E).astype(jnp.float32)
    beta = params["beta"].reshape(1, E).astype(jnp.float32)
    # bf16 weights: MXU-native; accumulation stays f32 inside the kernel.
    w1 = params["w1"].astype(jnp.bfloat16)              # (E, H)
    b1 = params["b1"].reshape(1, H).astype(jnp.float32)
    w2 = params["w2"].astype(jnp.bfloat16)              # (H, E)
    b2 = params["b2"].reshape(1, E).astype(jnp.float32)
    if H_pad != H:
        # Zero-padding the hidden dim is exact: relu(0)=0 and zero w2 rows add 0.
        w1 = jnp.pad(w1, ((0, 0), (0, H_pad - H)))
        b1 = jnp.pad(b1, ((0, 0), (0, H_pad - H)))
        w2 = jnp.pad(w2, ((0, H_pad - H), (0, 0)))

    grid = (M_pad // tm, H_pad // th)

    out = pl.pallas_call(
        functools.partial(_ffn_kernel, eps=eps),
        out_shape=jax.ShapeDtypeStruct((M_pad, E), x.dtype),
        grid_spec=pltpu.PrefetchScalarGridSpec(
            num_scalar_prefetch=0,
            grid=grid,
            in_specs=[
                pl.BlockSpec((tm, E), lambda i, h: (i, 0)),   # x rows (resident across h)
                pl.BlockSpec((1, E), lambda i, h: (0, 0)),    # gamma
                pl.BlockSpec((1, E), lambda i, h: (0, 0)),    # beta
                pl.BlockSpec((E, th), lambda i, h: (0, h)),   # w1 hidden chunk
                pl.BlockSpec((1, th), lambda i, h: (0, h)),   # b1 hidden chunk
                pl.BlockSpec((th, E), lambda i, h: (h, 0)),   # w2 hidden chunk
                pl.BlockSpec((1, E), lambda i, h: (0, 0)),    # b2
            ],
            out_specs=pl.BlockSpec((tm, E), lambda i, h: (i, 0)),
            scratch_shapes=[
                pltpu.VMEM((tm, E), jnp.bfloat16),   # normalized activations
                pltpu.VMEM((tm, E), jnp.float32),    # f32 output accumulator
            ],
        ),
        compiler_params=pltpu.CompilerParams(
            dimension_semantics=("parallel", "arbitrary"),
            vmem_limit_bytes=48 * 1024 * 1024,
        ),
    )(x2d, gamma, beta, w1, b1, w2, b2)

    if M_pad != M:
        out = out[:M]
    return out.reshape(B, S, E)


def init_params(key, embedding_dim: int):
    """Deterministic init mirroring nn.Linear / nn.LayerNorm shapes."""
    hidden = embedding_dim * 4
    k1, k2, k3, k4 = jax.random.split(key, 4)
    bound1 = 1.0 / (embedding_dim ** 0.5)
    bound2 = 1.0 / (hidden ** 0.5)
    return {
        "gamma": jnp.ones((embedding_dim,), jnp.float32),
        "beta": jnp.zeros((embedding_dim,), jnp.float32),
        # stored as (in, out) == torch W.T
        "w1": jax.random.uniform(k1, (embedding_dim, hidden), jnp.float32,
                                 -bound1, bound1),
        "b1": jax.random.uniform(k2, (hidden,), jnp.float32, -bound1, bound1),
        "w2": jax.random.uniform(k3, (hidden, embedding_dim), jnp.float32,
                                 -bound2, bound2),
        "b2": jax.random.uniform(k4, (embedding_dim,), jnp.float32,
                                 -bound2, bound2),
    }


def _reference(x, p, eps=1e-5):
    mean = jnp.mean(x, axis=-1, keepdims=True)
    var = jnp.mean((x - mean) ** 2, axis=-1, keepdims=True)
    xn = (x - mean) / jnp.sqrt(var + eps) * p["gamma"] + p["beta"]
    h = jnp.maximum(xn @ p["w1"] + p["b1"], 0.0)
    return h @ p["w2"] + p["b2"] + x


if __name__ == "__main__":
    # E=128 keeps the output block lane-dense (multiple of 128 lanes).
    batch, seq, embedding_dim = 2, 8, 128
    key = jax.random.PRNGKey(0)
    kx, kp = jax.random.split(key)

    x = jax.random.normal(kx, (batch, seq, embedding_dim), jnp.float32)
    params = init_params(kp, embedding_dim)

    out = feed_forward_layer(x, params)
    out = jax.block_until_ready(out)

    ref = _reference(x, params)
    assert out.shape == (batch, seq, embedding_dim)
    # bf16 MXU matmuls with f32 accumulation -> loosen tolerance vs pure-f32 ref.
    assert jnp.allclose(out, ref, atol=5e-2, rtol=5e-2), "mismatch vs reference"
    print("KERNEL_OK")
</pallas_src>

<mosaic_0001>
module attributes {stable_mosaic.version = 11 : i64} {
  func.func @_ffn_kernel(%arg0: i32, %arg1: i32, %arg2: memref<16x128xf32, #tpu.memory_space<vmem>>, %arg3: memref<1x128xf32, #tpu.memory_space<vmem>>, %arg4: memref<1x128xf32, #tpu.memory_space<vmem>>, %arg5: memref<128x512xbf16, #tpu.memory_space<vmem>>, %arg6: memref<1x512xf32, #tpu.memory_space<vmem>>, %arg7: memref<512x128xbf16, #tpu.memory_space<vmem>>, %arg8: memref<1x128xf32, #tpu.memory_space<vmem>>, %arg9: memref<16x128xf32, #tpu.memory_space<vmem>>, %arg10: memref<16x128xbf16, #tpu.memory_space<vmem>>, %arg11: memref<16x128xf32, #tpu.memory_space<vmem>>) attributes {dimension_semantics = [#tpu.dimension_semantics<parallel>, #tpu.dimension_semantics<arbitrary>], iteration_bounds = array<i64: 1, 1>, scalar_prefetch = 0 : i64, scratch_operands = 2 : i64, tpu.core_type = #tpu.core_type<tc>, window_params = [{transform_indices = @transform_0, window_bounds = array<i64: 16, 128>}, {pipeline_mode = #tpu.pipeline_mode<synchronous>, transform_indices = @transform_1, window_bounds = array<i64: 1, 128>}, {pipeline_mode = #tpu.pipeline_mode<synchronous>, transform_indices = @transform_2, window_bounds = array<i64: 1, 128>}, {transform_indices = @transform_3, window_bounds = array<i64: 128, 512>}, {transform_indices = @transform_4, window_bounds = array<i64: 1, 512>}, {transform_indices = @transform_5, window_bounds = array<i64: 512, 128>}, {pipeline_mode = #tpu.pipeline_mode<synchronous>, transform_indices = @transform_6, window_bounds = array<i64: 1, 128>}, {transform_indices = @transform_7, window_bounds = array<i64: 16, 128>}]} {
    %c0_i32 = arith.constant 0 : i32
    %0 = arith.cmpi eq, %arg1, %c0_i32 : i32
    %1 = arith.extui %0 : i1 to i32
    %c0_i32_0 = arith.constant 0 : i32
    %2 = arith.cmpi ne, %1, %c0_i32_0 : i32
    scf.if %2 {
      %c0_16 = arith.constant 0 : index
      %c0_17 = arith.constant 0 : index
      %20 = vector.load %arg2[%c0_16, %c0_17] : memref<16x128xf32, #tpu.memory_space<vmem>>, vector<16x128xf32>
      %cst_18 = arith.constant dense<0.000000e+00> : vector<16xf32>
      %21 = vector.multi_reduction <add>, %20, %cst_18 [1] : vector<16x128xf32> to vector<16xf32>
      %22 = vector.shape_cast %21 : vector<16xf32> to vector<16x1xf32>
      %cst_19 = arith.constant 1.280000e+02 : f32
      %23 = vector.broadcast %cst_19 : f32 to vector<16x1xf32>
      %24 = arith.divf %22, %23 : vector<16x1xf32>
      %25 = arith.mulf %20, %20 : vector<16x128xf32>
      %cst_20 = arith.constant dense<0.000000e+00> : vector<16xf32>
      %26 = vector.multi_reduction <add>, %25, %cst_20 [1] : vector<16x128xf32> to vector<16xf32>
      %27 = vector.shape_cast %26 : vector<16xf32> to vector<16x1xf32>
      %cst_21 = arith.constant 1.280000e+02 : f32
      %28 = vector.broadcast %cst_21 : f32 to vector<16x1xf32>
      %29 = arith.divf %27, %28 : vector<16x1xf32>
      %30 = arith.mulf %24, %24 : vector<16x1xf32>
      %31 = arith.subf %29, %30 : vector<16x1xf32>
      %32 = vector.broadcast %24 : vector<16x1xf32> to vector<16x128xf32>
      %33 = arith.subf %20, %32 : vector<16x128xf32>
      %cst_22 = arith.constant 9.99999974E-6 : f32
      %34 = vector.broadcast %cst_22 : f32 to vector<16x1xf32>
      %35 = arith.addf %31, %34 : vector<16x1xf32>
      %36 = math.rsqrt %35 : vector<16x1xf32>
      %37 = vector.broadcast %36 : vector<16x1xf32> to vector<16x128xf32>
      %38 = arith.mulf %33, %37 : vector<16x128xf32>
      %c0_23 = arith.constant 0 : index
      %c0_24 = arith.constant 0 : index
      %39 = vector.load %arg3[%c0_23, %c0_24] : memref<1x128xf32, #tpu.memory_space<vmem>>, vector<1x128xf32>
      %40 = vector.broadcast %39 : vector<1x128xf32> to vector<16x128xf32>
      %41 = arith.mulf %38, %40 : vector<16x128xf32>
      %c0_25 = arith.constant 0 : index
      %c0_26 = arith.constant 0 : index
      %42 = vector.load %arg4[%c0_25, %c0_26] : memref<1x128xf32, #tpu.memory_space<vmem>>, vector<1x128xf32>
      %43 = vector.broadcast %42 : vector<1x128xf32> to vector<16x128xf32>
      %44 = arith.addf %41, %43 : vector<16x128xf32>
      %45 = arith.truncf %44 : vector<16x128xf32> to vector<16x128xbf16>
      %c0_27 = arith.constant 0 : index
      %c0_28 = arith.constant 0 : index
      %46 = vector.load %arg10[%c0_27, %c0_28] : memref<16x128xbf16, #tpu.memory_space<vmem>>, vector<16x128xbf16>
      tpu.vector_store %arg10[%c0_27, %c0_28], %45 {strides = array<i32>} : memref<16x128xbf16, #tpu.memory_space<vmem>>, vector<16x128xbf16>,
      %cst_29 = arith.constant 0.000000e+00 : f32
      %47 = vector.broadcast %cst_29 : f32 to vector<16x128xf32>
      %c0_30 = arith.constant 0 : index
      %c0_31 = arith.constant 0 : index
      %48 = vector.load %arg11[%c0_30, %c0_31] : memref<16x128xf32, #tpu.memory_space<vmem>>, vector<16x128xf32>
      tpu.vector_store %arg11[%c0_30, %c0_31], %47 {strides = array<i32>} : memref<16x128xf32, #tpu.memory_space<vmem>>, vector<16x128xf32>,
    } else {
    }
    %c0 = arith.constant 0 : index
    %c0_1 = arith.constant 0 : index
    %3 = vector.load %arg10[%c0, %c0_1] : memref<16x128xbf16, #tpu.memory_space<vmem>>, vector<16x128xbf16>
    %c0_2 = arith.constant 0 : index
    %c0_3 = arith.constant 0 : index
    %4 = vector.load %arg5[%c0_2, %c0_3] : memref<128x512xbf16, #tpu.memory_space<vmem>>, vector<128x512xbf16>
    %cst = arith.constant dense<0.000000e+00> : vector<16x512xf32>
    %5 = tpu.matmul %3, %4, %cst {dimension_numbers = #tpu.dot_dimension_numbers<[1], [0], [0], [1], [0, 0, 1, 1], [], []>} : vector<16x128xbf16>, vector<128x512xbf16>, vector<16x512xf32> -> vector<16x512xf32>
    %c0_4 = arith.constant 0 : index
    %c0_5 = arith.constant 0 : index
    %6 = vector.load %arg6[%c0_4, %c0_5] : memref<1x512xf32, #tpu.memory_space<vmem>>, vector<1x512xf32>
    %7 = vector.broadcast %6 : vector<1x512xf32> to vector<16x512xf32>
    %8 = arith.addf %5, %7 : vector<16x512xf32>
    %cst_6 = arith.constant 0.000000e+00 : f32
    %9 = vector.broadcast %cst_6 : f32 to vector<16x512xf32>
    %10 = arith.maximumf %8, %9 : vector<16x512xf32>
    %c0_7 = arith.constant 0 : index
    %c0_8 = arith.constant 0 : index
    %11 = vector.load %arg11[%c0_7, %c0_8] : memref<16x128xf32, #tpu.memory_space<vmem>>, vector<16x128xf32>
    %12 = arith.truncf %10 : vector<16x512xf32> to vector<16x512xbf16>
    %c0_9 = arith.constant 0 : index
    %c0_10 = arith.constant 0 : index
    %13 = vector.load %arg7[%c0_9, %c0_10] : memref<512x128xbf16, #tpu.memory_space<vmem>>, vector<512x128xbf16>
    %cst_11 = arith.constant dense<0.000000e+00> : vector<16x128xf32>
    %14 = tpu.matmul %12, %13, %cst_11 {dimension_numbers = #tpu.dot_dimension_numbers<[1], [0], [0], [1], [0, 0, 1, 1], [], []>} : vector<16x512xbf16>, vector<512x128xbf16>, vector<16x128xf32> -> vector<16x128xf32>
    %15 = arith.addf %11, %14 : vector<16x128xf32>
    %c0_12 = arith.constant 0 : index
    %c0_13 = arith.constant 0 : index
    %16 = vector.load %arg11[%c0_12, %c0_13] : memref<16x128xf32, #tpu.memory_space<vmem>>, vector<16x128xf32>
    tpu.vector_store %arg11[%c0_12, %c0_13], %15 {strides = array<i32>} : memref<16x128xf32, #tpu.memory_space<vmem>>, vector<16x128xf32>,
    %c0_i32_14 = arith.constant 0 : i32
    %17 = arith.cmpi eq, %arg1, %c0_i32_14 : i32
    %18 = arith.extui %17 : i1 to i32
    %c0_i32_15 = arith.constant 0 : i32
    %19 = arith.cmpi ne, %18, %c0_i32_15 : i32
    scf.if %19 {
      %c0_16 = arith.constant 0 : index
      %c0_17 = arith.constant 0 : index
      %20 = vector.load %arg11[%c0_16, %c0_17] : memref<16x128xf32, #tpu.memory_space<vmem>>, vector<16x128xf32>
      %c0_18 = arith.constant 0 : index
      %c0_19 = arith.constant 0 : index
      %21 = vector.load %arg8[%c0_18, %c0_19] : memref<1x128xf32, #tpu.memory_space<vmem>>, vector<1x128xf32>
      %22 = vector.broadcast %21 : vector<1x128xf32> to vector<16x128xf32>
      %23 = arith.addf %20, %22 : vector<16x128xf32>
      %c0_20 = arith.constant 0 : index
      %c0_21 = arith.constant 0 : index
      %24 = vector.load %arg2[%c0_20, %c0_21] : memref<16x128xf32, #tpu.memory_space<vmem>>, vector<16x128xf32>
      %25 = arith.addf %23, %24 : vector<16x128xf32>
      %c0_22 = arith.constant 0 : index
      %c0_23 = arith.constant 0 : index
      %26 = vector.load %arg9[%c0_22, %c0_23] : memref<16x128xf32, #tpu.memory_space<vmem>>, vector<16x128xf32>
      tpu.vector_store %arg9[%c0_22, %c0_23], %25 {strides = array<i32>} : memref<16x128xf32, #tpu.memory_space<vmem>>, vector<16x128xf32>,
    } else {
    }
    return
  }
  func.func @transform_0(%arg0: i32, %arg1: i32) -> (i32, i32) {
    %c0_i32 = arith.constant 0 : i32
    %c0_i32_0 = arith.constant 0 : i32
    return %arg0, %c0_i32 : i32, i32
  }
  func.func @transform_1(%arg0: i32, %arg1: i32) -> (i32, i32) {
    %c0_i32 = arith.constant 0 : i32
    %c0_i32_0 = arith.constant 0 : i32
    %c0_i32_1 = arith.constant 0 : i32
    return %c0_i32, %c0_i32_0 : i32, i32
  }
  func.func @transform_2(%arg0: i32, %arg1: i32) -> (i32, i32) {
    %c0_i32 = arith.constant 0 : i32
    %c0_i32_0 = arith.constant 0 : i32
    %c0_i32_1 = arith.constant 0 : i32
    return %c0_i32, %c0_i32_0 : i32, i32
  }
  func.func @transform_3(%arg0: i32, %arg1: i32) -> (i32, i32) {
    %c0_i32 = arith.constant 0 : i32
    %c0_i32_0 = arith.constant 0 : i32
    return %c0_i32, %arg1 : i32, i32
  }
  func.func @transform_4(%arg0: i32, %arg1: i32) -> (i32, i32) {
    %c0_i32 = arith.constant 0 : i32
    %c0_i32_0 = arith.constant 0 : i32
    return %c0_i32, %arg1 : i32, i32
  }
  func.func @transform_5(%arg0: i32, %arg1: i32) -> (i32, i32) {
    %c0_i32 = arith.constant 0 : i32
    %c0_i32_0 = arith.constant 0 : i32
    return %arg1, %c0_i32 : i32, i32
  }
  func.func @transform_6(%arg0: i32, %arg1: i32) -> (i32, i32) {
    %c0_i32 = arith.constant 0 : i32
    %c0_i32_0 = arith.constant 0 : i32
    %c0_i32_1 = arith.constant 0 : i32
    return %c0_i32, %c0_i32_0 : i32, i32
  }
  func.func @transform_7(%arg0: i32, %arg1: i32) -> (i32, i32) {
    %c0_i32 = arith.constant 0 : i32
    %c0_i32_0 = arith.constant 0 : i32
    return %arg0, %c0_i32 : i32, i32
  }
}

</mosaic_0001>

<bundles_post_ra>
// kernel: tpu_custom_call.1
= control target key start
LH: loop header
LB: loop body
LE: loop exit
PB: predicated region body
PF: predicated region fallthrough
CT: control target
= control target key end

     0   :  { %12 = vsyncpa [#allocation5], 0  ;;  %s1432_s0 = inlined_call_operand.hbm [shape: f32[16,128], index: 0, kind: input, shape index: {}]   ;;  %s1433_s1 = inlined_call_operand.hbm [shape: f32[1,128], index: 1, kind: input, shape index: {}]   ;;  %s1434_s2 = inlined_call_operand.vmem [shape: f32[1,128], index: 2, kind: input, shape index: {}]   ;;  %s1435_s3 = inlined_call_operand.hbm [shape: bf16[128,512], index: 3, kind: input, shape index: {}]   ;;  %s1436_s4 = inlined_call_operand.hbm [shape: f32[1,512], index: 4, kind: input, shape index: {}]   ;;  %s1437_s5 = inlined_call_operand.hbm [shape: bf16[512,128], index: 5, kind: input, shape index: {}]   ;;  %s1438_s6 = inlined_call_operand.vmem [shape: f32[1,128], index: 6, kind: input, shape index: {}]   ;;  %s1439_s7 = inlined_call_operand.hbm [shape: f32[16,128], index: 7, kind: output, shape index: {}]  }
   0x1   :  { %13 = vsyncpa [#allocation8], 0 }
   0x2   :  { %14 = vsyncpa [#allocation11], 0  ;;  %s34_s26 = sshll.u32 %s1433_s1, 4  ;;  %s35_s26 = int_to_ptr.hbm [resolvable:$true] %s34_s26 }
   0x3   :  { %15 = vsyncpa [#allocation6], 0  ;;  %s1314_s27 = smov [#allocation7]   ;;  %s60_s8 = sshll.u32 %s1436_s4, 4  ;;  %s61_s8 = int_to_ptr.hbm [resolvable:$true] %s60_s8 }
   0x4   :  { %s36_s28 = sshll.u32 %s1314_s27, 4  ;;  %s1315_s9 = smov [#allocation10]   ;;  %s37_s28 = int_to_ptr.vmem [resolvable:$true] %s36_s28 }
   0x5   :  { %39 = dma.hbm_to_vmem [thread:$0]  %s35_s26, 16, %s37_s28, [#allocation8]  }
   0x6   :  { %s62_s10 = sshll.u32 %s1315_s9, 4  ;;  %s20_s13 = sshll.u32 %s1432_s0, 4  ;;  %s63_s10 = int_to_ptr.vmem [resolvable:$true] %s62_s10  ;;  %s21_s13 = int_to_ptr.hbm [resolvable:$true] %s20_s13 }
   0x7   :  { %65 = dma.hbm_to_vmem [thread:$0]  %s61_s8, 64, %s63_s10, [#allocation11]  }
   0x8   :  { %s1316_s1 = smov [#allocation4]   ;;  %s46_s17 = sshll.u32 %s1435_s3, 4  ;;  %s47_s17 = int_to_ptr.hbm [resolvable:$true] %s46_s17 }
   0x9   :  { %s22_s14 = sshll.u32 %s1316_s1, 4  ;;  %s1317_s18 = smov 128   ;;  %s23_s14 = int_to_ptr.vmem [resolvable:$true] %s22_s14 }
   0xa   :  { %s1318_s4 = smov 8   ;;  %s1319_s19 = smov [#allocation9]  }
   0xb   :  { %28 = dma.hbm_to_vmem [thread:$0]  %s21_s13, 256, %s23_s14, [#allocation5], %s1317_s18, %s1317_s18, %s1318_s4  }
   0xc   :  { %s48_s20 = sshll.u32 %s1319_s19, 4  ;;  %s1320_s0 = smov 256   ;;  %s49_s20 = int_to_ptr.vmem [resolvable:$true] %s48_s20 }
   0xd   :  { %s1321_s21 = smov 16   ;;  %s70_s24 = sshll.u32 %s1437_s5, 4  ;;  %s71_s24 = int_to_ptr.hbm [resolvable:$true] %s70_s24 }
   0xe   :  { %54 = dma.hbm_to_vmem [thread:$0]  %s47_s17, 4096, %s49_s20, [#allocation8], %s1320_s0, %s1320_s0, %s1321_s21  }
   0xf   :  { %s1322_s25 = smov [#allocation12]   ;;  %s1323_s26 = smov 64  }
  0x10   :  { %s72_s3 = sshll.u32 %s1322_s25, 4  ;;  %s1324_s27 = smov 4   ;;  %s73_s3 = int_to_ptr.vmem [resolvable:$true] %s72_s3 }
  0x11   :  { %78 = dma.hbm_to_vmem [thread:$0]  %s71_s24, 4096, %s73_s3, [#allocation11], %s1323_s26, %s1323_s26, %s1324_s27  }
  0x12   :  { %1306 = dma.done.wait [#allocation5], 256  }
  0x13   :  { %1307 = vsyncadd [#allocation5], 4294967040 }
  0x14   :  { %1308 = dma.done.wait [#allocation8], 4112  }
  0x15   :  { %1309 = vsyncadd [#allocation8], 4294963184 }
  0x16   :  { %1310 = dma.done.wait [#allocation11], 4160  }
  0x17   :  { %1311 = vsyncadd [#allocation11], 4294963136  ;;  %v1385_v0 = vld [vmem:[#allocation4] sm:$0xff]  ;;  %v1390_v2 = vld [vmem:[#allocation4 + $0x8] sm:$0xff]  ;;  %v1325_v4 = vmov 128.0   ;;  %s1326_s30 = smov [#allocation13]  }
  0x18   :  { %107 = vadd.xlane.f32.xlu0 %v1385_v0  ;;  %v120_v1 = vmul.f32 %v1385_v0, %v1385_v0  ;;  %v121_v3 = vmul.f32 %v1390_v2, %v1390_v2  ;;  %1156 = vrcp.f32 %v1325_v4  ;;  %v928_v8 = vld [vmem:[#allocation9 + $0xe0] sm:$0xf]  ;;  %v1101_v9 = vld [vmem:[#allocation9 + $0xec] sm:$0xf0]  ;;  %v1099_v10 = vld [vmem:[#allocation9 + $0xe4] sm:$0xf] }
  0x19   :  { %v929_v11 = vor.u32 %v1101_v9, %v928_v8  ;;  %v930_v12 = vld [vmem:[#allocation9 + $0xf0] sm:$0xf0]  ;;  %v936_v13 = vld [vmem:[#allocation9 + $0xe8] sm:$0xf]  ;;  %v1102_v14 = vld [vmem:[#allocation9 + $0xf4] sm:$0xf0] }
  0x1a   :  { %122 = vadd.xlane.f32.xlu1 %v120_v1  ;;  %v933_v15 = vor.u32 %v1099_v10, %v930_v12  ;;  %v937_v16 = vor.u32 %v1102_v14, %v936_v13  ;;  %v1100_v17 = vld [vmem:[#allocation9 + $0xec] sm:$0xf]  ;;  %v938_v18 = vld [vmem:[#allocation9 + $0xf8] sm:$0xf0]  ;;  %v912_v21 = vld [vmem:[#allocation9 + $0xc0] sm:$0xf] }
  0x1b   :  { %386 = vmatpush.bf16.msra.mxu0 %v929_v11  ;;  %v941_v19 = vor.u32 %v1100_v17, %v938_v18  ;;  %v1097_v22 = vld [vmem:[#allocation9 + $0xcc] sm:$0xf0]  ;;  %v1095_v23 = vld [vmem:[#allocation9 + $0xc4] sm:$0xf]  ;;  %v914_v25 = vld [vmem:[#allocation9 + $0xd0] sm:$0xf0] }
  0x1c   :  { %400 = vmatpush.bf16.msra.mxu1 %v933_v15  ;;  %414 = vmatpush.bf16.msra.mxu2 %v937_v16  ;;  %v913_v24 = vor.u32 %v1097_v22, %v912_v21  ;;  %v920_v26 = vld [vmem:[#allocation9 + $0xc8] sm:$0xf]  ;;  %v1098_v27 = vld [vmem:[#allocation9 + $0xd4] sm:$0xf0]  ;;  %v917_v28 = vor.u32 %v1095_v23, %v914_v25  ;;  %v1096_v30 = vld [vmem:[#allocation9 + $0xcc] sm:$0xf] }
  0x1d   :  { %428 = vmatpush.bf16.msra.mxu3 %v941_v19  ;;  %v921_v29 = vor.u32 %v1098_v27, %v920_v26  ;;  %v922_v31 = vld [vmem:[#allocation9 + $0xd8] sm:$0xf0]  ;;  %v896_v34 = vld [vmem:[#allocation9 + $0xa0] sm:$0xf]  ;;  %v1093_v35 = vld [vmem:[#allocation9 + $0xac] sm:$0xf0] }
  0x1e   :  { %v1157_v5 = vpop.eup %1156  ;;  %v925_v32 = vor.u32 %v1096_v30, %v922_v31  ;;  %v1091_v36 = vld [vmem:[#allocation9 + $0xa4] sm:$0xf]  ;;  %v897_v37 = vor.u32 %v1093_v35, %v896_v34  ;;  %v898_v38 = vld [vmem:[#allocation9 + $0xb0] sm:$0xf0]  ;;  %v904_v39 = vld [vmem:[#allocation9 + $0xa8] sm:$0xf] }
  0x1f   :  { %v112_v6 = vmul.f32 128.0, %v1157_v5  ;;  %387 = vmatpush.bf16.msra.mxu0 %v913_v24  ;;  %vm116_vm0 = vweird.f32 %v1157_v5  ;;  %v1094_v40 = vld [vmem:[#allocation9 + $0xb4] sm:$0xf0]  ;;  %v901_v41 = vor.u32 %v1091_v36, %v898_v38  ;;  %v1092_v43 = vld [vmem:[#allocation9 + $0xac] sm:$0xf]  ;;  %s793_s8 = sshll.u32 %s1326_s30, 4  ;;  %s794_s8 = int_to_ptr.vmem [resolvable:$true] %s793_s8 }
  0x20   :  { %109 = vadd.xlane.f32.xlu0 %v1390_v2  ;;  %401 = vmatpush.bf16.msra.mxu1 %v917_v28  ;;  %v905_v42 = vor.u32 %v1094_v40, %v904_v39  ;;  %v906_v44 = vld [vmem:[#allocation9 + $0xb8] sm:$0xf0]  ;;  %v880_v47 = vld [vmem:[#allocation9 + $0x80] sm:$0xf]  ;;  %v1089_v48 = vld [vmem:[#allocation9 + $0x8c] sm:$0xf0] }
  0x21   :  { %v113_v7 = vsub.f32 1.0, %v112_v6  ;;  %415 = vmatpush.bf16.msra.mxu2 %v921_v29  ;;  %429 = vmatpush.bf16.msra.mxu3 %v925_v32  ;;  %v909_v45 = vor.u32 %v1092_v43, %v906_v44  ;;  %v1087_v49 = vld [vmem:[#allocation9 + $0x84] sm:$0xf]  ;;  %v881_v50 = vor.u32 %v1089_v48, %v880_v47  ;;  %v882_v51 = vld [vmem:[#allocation9 + $0x90] sm:$0xf0]  ;;  %s795_s11 = sshll.u32 %s1439_s7, 4  ;;  %s796_s11 = int_to_ptr.hbm [resolvable:$true] %s795_s11 }
  0x22   :  { %124 = vadd.xlane.f32.xlu1 %v121_v3  ;;  %v888_v52 = vld [vmem:[#allocation9 + $0x88] sm:$0xf]  ;;  %v1090_v53 = vld [vmem:[#allocation9 + $0x94] sm:$0xf0]  ;;  %v885_v55 = vor.u32 %v1087_v49, %v882_v51  ;;  %v1088_v57 = vld [vmem:[#allocation9 + $0x8c] sm:$0xf] }
  0x23   :  { %v114_v20 = vmul.f32 %v1157_v5, %v113_v7  ;;  %388 = vmatpush.bf16.msra.mxu0 %v897_v37  ;;  %v889_v56 = vor.u32 %v1090_v53, %v888_v52  ;;  %v890_v58 = vld [vmem:[#allocation9 + $0x98] sm:$0xf0]  ;;  %v864_v62 = vld [vmem:[#allocation9 + $0x60] sm:$0xf]  ;;  %v1085_v63 = vld [vmem:[#allocation9 + $0x6c] sm:$0xf0] }
  0x24   :  { %402 = vmatpush.bf16.msra.mxu1 %v901_v41  ;;  %v893_v60 = vor.u32 %v1088_v57, %v890_v58  ;;  %v1083_v1 = vld [vmem:[#allocation9 + $0x64] sm:$0xf]  ;;  %v866_v6 = vld [vmem:[#allocation9 + $0x70] sm:$0xf0]  ;;  %v872_v7 = vld [vmem:[#allocation9 + $0x68] sm:$0xf] }
  0x25   :  { %v115_v33 = vadd.f32 %v1157_v5, %v114_v20  ;;  %416 = vmatpush.bf16.msra.mxu2 %v905_v42  ;;  %430 = vmatpush.bf16.msra.mxu3 %v909_v45  ;;  %v1086_v8 = vld [vmem:[#allocation9 + $0x74] sm:$0xf0]  ;;  %v869_v9 = vor.u32 %v1083_v1, %v866_v6  ;;  %v1084_v11 = vld [vmem:[#allocation9 + $0x6c] sm:$0xf]  ;;  %v874_v12 = vld [vmem:[#allocation9 + $0x78] sm:$0xf0] }
  0x26   :  { %v873_v10 = vor.u32 %v1086_v8, %v872_v7  ;;  %v877_v14 = vor.u32 %v1084_v11, %v874_v12  ;;  %v848_v15 = vld [vmem:[#allocation9 + $0x40] sm:$0xf]  ;;  %v1081_v16 = vld [vmem:[#allocation9 + $0x4c] sm:$0xf0]  ;;  %v1079_v17 = vld [vmem:[#allocation9 + $0x44] sm:$0xf] }
  0x27   :  { %v1395_v46 = vsel %vm116_vm0, %v1157_v5, %v115_v33  ;;  %389 = vmatpush.bf16.msra.mxu0 %v881_v50  ;;  %v865_v5 = vor.u32 %v1085_v63, %v864_v62  ;;  %v849_v19 = vor.u32 %v1081_v16, %v848_v15  ;;  %v850_v20 = vld [vmem:[#allocation9 + $0x50] sm:$0xf0]  ;;  %v856_v21 = vld [vmem:[#allocation9 + $0x48] sm:$0xf]  ;;  %v1082_v24 = vld [vmem:[#allocation9 + $0x54] sm:$0xf0] }
  0x28   :  { %403 = vmatpush.bf16.msra.mxu1 %v885_v55  ;;  %v853_v23 = vor.u32 %v1079_v17, %v850_v20  ;;  %v1080_v25 = vld [vmem:[#allocation9 + $0x4c] sm:$0xf]  ;;  %v858_v26 = vld [vmem:[#allocation9 + $0x58] sm:$0xf0]  ;;  %v857_v28 = vor.u32 %v1082_v24, %v856_v21  ;;  %v832_v31 = vld [vmem:[#allocation9 + $0x20] sm:$0xf] }
  0x29   :  { %417 = vmatpush.bf16.msra.mxu2 %v889_v56  ;;  %431 = vmatpush.bf16.msra.mxu3 %v893_v60  ;;  %v861_v30 = vor.u32 %v1080_v25, %v858_v26  ;;  %v1077_v32 = vld [vmem:[#allocation9 + $0x2c] sm:$0xf0]  ;;  %v1075_v33 = vld [vmem:[#allocation9 + $0x24] sm:$0xf]  ;;  %v834_v37 = vld [vmem:[#allocation9 + $0x30] sm:$0xf0] }
  0x2a   :  { %v833_v36 = vor.u32 %v1077_v32, %v832_v31  ;;  %v840_v38 = vld [vmem:[#allocation9 + $0x28] sm:$0xf]  ;;  %v1078_v39 = vld [vmem:[#allocation9 + $0x34] sm:$0xf0]  ;;  %v837_v40 = vor.u32 %v1075_v33, %v834_v37  ;;  %v1076_v42 = vld [vmem:[#allocation9 + $0x2c] sm:$0xf] }
  0x2b   :  { %390 = vmatpush.bf16.msra.mxu0 %v865_v5  ;;  %v841_v41 = vor.u32 %v1078_v39, %v840_v38  ;;  %v842_v43 = vld [vmem:[#allocation9 + $0x38] sm:$0xf0]  ;;  %v816_v44 = vld [vmem:[#allocation9] sm:$0xf]  ;;  %v1073_v48 = vld [vmem:[#allocation9 + $0xc] sm:$0xf0] }
  0x2c   :  { %404 = vmatpush.bf16.msra.mxu1 %v869_v9  ;;  %v845_v47 = vor.u32 %v1076_v42, %v842_v43  ;;  %v1071_v49 = vld [vmem:[#allocation9 + $0x4] sm:$0xf]  ;;  %v818_v50 = vld [vmem:[#allocation9 + $0x10] sm:$0xf0]  ;;  %v817_v51 = vor.u32 %v1073_v48, %v816_v44  ;;  %v824_v52 = vld [vmem:[#allocation9 + $0x8] sm:$0xf] }
  0x2d   :  { %418 = vmatpush.bf16.msra.mxu2 %v873_v10  ;;  %432 = vmatpush.bf16.msra.mxu3 %v877_v14  ;;  %v1074_v53 = vld [vmem:[#allocation9 + $0x14] sm:$0xf0]  ;;  %v826_v58 = vld [vmem:[#allocation9 + $0x18] sm:$0xf0]  ;;  %v1108_v15 = vld [vmem:[#allocation12 + $0x28] sm:$0xff] }
  0x2e   :  { %v825_v57 = vor.u32 %v1074_v53, %v824_v52  ;;  %v1110_v1 = vld [vmem:[#allocation12 + $0x38] sm:$0xff]  ;;  %v1109_v8 = vld [vmem:[#allocation12 + $0x30] sm:$0xff]  ;;  %v1116_v16 = vld [vmem:[#allocation12 + $0x68] sm:$0xff] }
  0x2f   :  { %391 = vmatpush.bf16.msra.mxu0 %v849_v19  ;;  %v1126_v5 = vld [vmem:[#allocation12 + $0xb8] sm:$0xff]  ;;  %v1117_v9 = vld [vmem:[#allocation12 + $0x70] sm:$0xff]  ;;  %v1124_v20 = vld [vmem:[#allocation12 + $0xa8] sm:$0xff] }
  0x30   :  { %405 = vmatpush.bf16.msra.mxu1 %v853_v23  ;;  %v1134_v6 = vld [vmem:[#allocation12 + $0xf8] sm:$0xff]  ;;  %v1125_v12 = vld [vmem:[#allocation12 + $0xb0] sm:$0xff]  ;;  %v1132_v21 = vld [vmem:[#allocation12 + $0xe8] sm:$0xff] }
  0x31   :  { %419 = vmatpush.bf16.msra.mxu2 %v857_v28  ;;  %433 = vmatpush.bf16.msra.mxu3 %v861_v30  ;;  %v1153_v24 = vld [vmem:[#allocation7] ss:$0 sm:$0xff]  ;;  %v1115_v26 = vld [vmem:[#allocation12 + $0x60] sm:$0xff]  ;;  %v1113_v42 = vld [vmem:[#allocation12 + $0x50] sm:$0xff] }
  0x32   :  { %v1114_v38 = vld [vmem:[#allocation12 + $0x58] sm:$0xff]  ;;  %v1123_v39 = vld [vmem:[#allocation12 + $0xa0] sm:$0xff]  ;;  %v1121_v48 = vld [vmem:[#allocation12 + $0x90] sm:$0xff] }
  0x33   :  { %392 = vmatpush.bf16.msra.mxu0 %v833_v36  ;;  %v1122_v43 = vld [vmem:[#allocation12 + $0x98] sm:$0xff]  ;;  %v1128_v52 = vld [vmem:[#allocation12 + $0xc8] sm:$0xff]  ;;  %v1119_v53 = vld [vmem:[#allocation12 + $0x80] sm:$0xff] }
  0x34   :  { %406 = vmatpush.bf16.msra.mxu1 %v837_v40  ;;  %v1131_v40 = vld [vmem:[#allocation12 + $0xe0] sm:$0xff]  ;;  %v1130_v44 = vld [vmem:[#allocation12 + $0xd8] sm:$0xff] }
  0x35   :  { %420 = vmatpush.bf16.msra.mxu2 %v841_v41  ;;  %434 = vmatpush.bf16.msra.mxu3 %v845_v47  ;;  %v1105_v41 = vld [vmem:[#allocation12 + $0x10] sm:$0xff]  ;;  %v1112_v47 = vld [vmem:[#allocation12 + $0x48] sm:$0xff] }
  0x37   :  { %393 = vmatpush.bf16.msra.mxu0 %v817_v51  ;;  %v1111_v51 = vld [vmem:[#allocation12 + $0x40] sm:$0xff] }
  0x39   :  { %421 = vmatpush.bf16.msra.mxu2 %v825_v57 }
  0x3b   :  { %712 = vmatpush.bf16.msrb.mxu0 %v1110_v1 }
  0x3d   :  { %740 = vmatpush.bf16.msrb.mxu2 %v1126_v5 }
  0x3f   :  { %713 = vmatpush.bf16.msrb.mxu0 %v1109_v8 }
  0x41   :  { %741 = vmatpush.bf16.msrb.mxu2 %v1125_v12 }
  0x43   :  { %714 = vmatpush.bf16.msrb.mxu0 %v1108_v15 }
  0x45   :  { %742 = vmatpush.bf16.msrb.mxu2 %v1124_v20 }
  0x49   :  { %743 = vmatpush.bf16.msrb.mxu2 %v1123_v39 }
  0x4d   :  { %744 = vmatpush.bf16.msrb.mxu2 %v1122_v43 }
  0x51   :  { %745 = vmatpush.bf16.msrb.mxu2 %v1121_v48 }
  0x8b   :  { %v108_v54 = vpop.xlane.xlu0 %107 }
  0x8c   :  { %v1398_v59 = vmul.f32 %v1395_v46, %v108_v54  ;;  %v1072_v54 = vld [vmem:[#allocation9 + $0xc] sm:$0xf] }
  0x8d   :  { %v123_v61 = vpop.xlane.xlu1 %122 }
  0x8e   :  { %v128_v3 = vmul.f32 %v1398_v59, %v1398_v59  ;;  %v126_v4 = vmul.f32 %v123_v61, %v1395_v46  ;;  %v829_v61 = vor.u32 %v1072_v54, %v826_v58  ;;  %v1127_v54 = vld [vmem:[#allocation12 + $0xc0] sm:$0xff] }
  0x90   :  { %v130_v13 = vsub.f32 %v126_v4, %v128_v3  ;;  %435 = vmatpush.bf16.msra.mxu3 %v829_v61  ;;  %v1118_v3 = vld [vmem:[#allocation12 + $0x78] sm:$0xff] }
  0x92   :  { %v1403_v18 = vadd.f32 1e-05, %v130_v13  ;;  %v1133_v13 = vld [vmem:[#allocation12 + $0xf0] sm:$0xff] }
  0x93   :  { %v110_v22 = vpop.xlane.xlu0 %109 }
  0x94   :  { %1158 = vrsqrt.f32 %v1403_v18  ;;  %v1407_v27 = vmul.f32 %v1395_v46, %v110_v22  ;;  %754 = vmatpush.bf16.msrb.mxu3 %v1134_v6  ;;  %vm142_vm2 = vweird.f32 %v1403_v18  ;;  %v132_v22 = vsub.f32 %v1385_v0, %v1398_v59  ;;  %v1154_v59 = vld [vmem:[%s1434_s2] ss:$0 sm:$0xff] }
  0x95   :  { %v125_v29 = vpop.xlane.xlu1 %124 }
  0x96   :  { %v129_v34 = vmul.f32 %v1407_v27, %v1407_v27  ;;  %v127_v35 = vmul.f32 %v125_v29, %v1395_v46  ;;  %v821_v46 = vor.u32 %v1071_v49, %v818_v50  ;;  %v133_v29 = vsub.f32 %v1390_v2, %v1407_v27  ;;  %v1106_v27 = vld [vmem:[#allocation12 + $0x18] sm:$0xff]  ;;  %v1129_v49 = vld [vmem:[#allocation12 + $0xd0] sm:$0xff]  ;;  %v1103_v50 = vld [vmem:[#allocation12] sm:$0xff] }
  0x98   :  { %v131_v45 = vsub.f32 %v127_v35, %v129_v34  ;;  %407 = vmatpush.bf16.msra.mxu1 %v821_v46  ;;  %755 = vmatpush.bf16.msrb.mxu3 %v1133_v13  ;;  %v1120_v46 = vld [vmem:[#allocation12 + $0x88] sm:$0xff] }
  0x99   :  { %746 = vmatpush.bf16.msrb.mxu2 %v1120_v46 }
  0x9a   :  { %v1159_v55 = vpop.eup %1158  ;;  %v135_v56 = vadd.f32 1e-05, %v131_v45  ;;  %v1104_v45 = vld [vmem:[#allocation12 + $0x8] sm:$0xff] }
  0x9b   :  { %v137_v60 = vmul.f32 %v1159_v55, %v1403_v18  ;;  %vm143_vm1 = vweird.f32 %v1159_v55  ;;  %v1107_v18 = vld [vmem:[#allocation12 + $0x20] sm:$0xff] }
  0x9c   :  { %1160 = vrsqrt.f32 %v135_v56  ;;  %726 = vmatpush.bf16.msrb.mxu1 %v1118_v3  ;;  %vm144_vm3 = vmor %vm142_vm2, %vm143_vm1  ;;  %vm152_vm5 = vweird.f32 %v135_v56  ;;  %756 = vmatpush.bf16.msrb.mxu3 %v1132_v21 }
  0x9d   :  { %v138_v62 = vmul.f32 %v1159_v55, %v137_v60  ;;  %715 = vmatpush.bf16.msrb.mxu0 %v1107_v18  ;;  %747 = vmatpush.bf16.msrb.mxu2 %v1119_v53 }
  0x9f   :  { %v139_v63 = vmul.f32 0.5, %v138_v62 }
  0xa0   :  { %727 = vmatpush.bf16.msrb.mxu1 %v1117_v9  ;;  %757 = vmatpush.bf16.msrb.mxu3 %v1131_v40 }
  0xa1   :  { %v140_v4 = vsub.f32 1.5, %v139_v63  ;;  %716 = vmatpush.bf16.msrb.mxu0 %v1106_v27 }
  0xa2   :  { %v1161_v7 = vpop.eup %1160 }
  0xa3   :  { %v141_v10 = vmul.f32 %v1159_v55, %v140_v4  ;;  %v147_v11 = vmul.f32 %v1161_v7, %v135_v56  ;;  %vm153_vm4 = vweird.f32 %v1161_v7 }
  0xa4   :  { %728 = vmatpush.bf16.msrb.mxu1 %v1116_v16  ;;  %vm154_vm6 = vmor %vm152_vm5, %vm153_vm4  ;;  %758 = vmatpush.bf16.msrb.mxu3 %v1130_v44 }
  0xa5   :  { %v148_v14 = vmul.f32 %v1161_v7, %v147_v11  ;;  %v145_v17 = vsel %vm144_vm3, %v1159_v55, %v141_v10  ;;  %717 = vmatpush.bf16.msrb.mxu0 %v1105_v41  ;;  %v210_v55 = vld [vmem:[#allocation10] sm:$0xf] }
  0xa6   :  { %v156_v25 = vmul.f32 %v145_v17, %v132_v22  ;;  %v212_v58 = vperm.slane %v210_v55, 0  ;;  %v213_v60 = vperm.slane %v210_v55, 1  ;;  %v215_v8 = vperm.slane %v210_v55, 3 }
  0xa7   :  { %v149_v19 = vmul.f32 0.5, %v148_v14 }
  0xa8   :  { %v162_v31 = vmul.f32 %v1153_v24, %v156_v25  ;;  %729 = vmatpush.bf16.msrb.mxu1 %v1115_v26  ;;  %759 = vmatpush.bf16.msrb.mxu3 %v1129_v49 }
  0xa9   :  { %v150_v23 = vsub.f32 1.5, %v149_v19  ;;  %718 = vmatpush.bf16.msrb.mxu0 %v1104_v45 }
  0xaa   :  { %v168_v34 = vadd.f32 %v1154_v59, %v162_v31 }
  0xab   :  { %v151_v28 = vmul.f32 %v1161_v7, %v150_v23 }
  0xac   :  { %730 = vmatpush.bf16.msrb.mxu1 %v1114_v38  ;;  %760 = vmatpush.bf16.msrb.mxu3 %v1128_v52 }
  0xad   :  { %v155_v30 = vsel %vm154_vm6, %v1161_v7, %v151_v28  ;;  %719 = vmatpush.bf16.msrb.mxu0 %v1103_v50  ;;  %v214_v7 = vperm.slane %v210_v55, 2 }
  0xae   :  { %v157_v32 = vmul.f32 %v155_v30, %v133_v29 }
  0xb0   :  { %v163_v33 = vmul.f32 %v1153_v24, %v157_v32  ;;  %731 = vmatpush.bf16.msrb.mxu1 %v1113_v42  ;;  %761 = vmatpush.bf16.msrb.mxu3 %v1127_v54 }
  0xb2   :  { %v169_v35 = vadd.f32 %v1154_v59, %v163_v33  ;;  %v1155_v33 = vld [vmem:[%s1438_s6] ss:$0 sm:$0xff] }
  0xb4   :  { %v1138_v36 = vpack.c.bf16 %v169_v35, %v168_v34  ;;  %732 = vmatpush.bf16.msrb.mxu1 %v1112_v47 }
  0xb6   :  { %1139 = vst [vmem:[#allocation2] sm:$0xff] %v1138_v36  }
  0xb8   :  { %733 = vmatpush.bf16.msrb.mxu1 %v1111_v51 }
  0xbd   :  { %v1070_v37 = vld [vmem:[#allocation2] sm:$0xff] }
  0xbe   :  { %394 = vmatmul.bf16.vlgmr.msra.gmra.mxu0 %v1070_v37  ;;  %408 = vmatmul.bf16.vlgmr.msra.gmra.mxu1 %v1070_v37 }
  0xbf   :  { %422 = vmatmul.bf16.vlgmr.msra.gmra.mxu2 %v1070_v37  ;;  %436 = vmatmul.bf16.vlgmr.msra.gmra.mxu3 %v1070_v37 }
 0x13b   :  { %v395_v56 = vpop.f32.mrf.mxu0  ;;  %v409_v57 = vpop.f32.mrf.mxu1 }
 0x13c   :  { %v396_v61 = vadd.f32 %v395_v56, %v212_v58  ;;  %v410_v62 = vadd.f32 %v409_v57, %v213_v60 }
 0x13e   :  { %v442_v9 = vmax.f32 %v396_v61, 0.0  ;;  %v443_v10 = vmax.f32 %v410_v62, 0.0 }
 0x142   :  { %v423_v63 = vpop.f32.mrf.mxu2  ;;  %v437_v1 = vpop.f32.mrf.mxu3 }
 0x143   :  { %v397_v3 = vpop.f32.mrf.mxu0  ;;  %v411_v4 = vpop.f32.mrf.mxu1  ;;  %v424_v15 = vadd.f32 %v423_v63, %v214_v7  ;;  %v438_v16 = vadd.f32 %v437_v1, %v215_v8 }
 0x144   :  { %v398_v5 = vadd.f32 %v397_v3, %v212_v58  ;;  %v412_v6 = vadd.f32 %v411_v4, %v213_v60 }
 0x145   :  { %v444_v22 = vmax.f32 %v424_v15, 0.0  ;;  %v445_v23 = vmax.f32 %v438_v16, 0.0 }
 0x146   :  { %v446_v11 = vmax.f32 %v398_v5, 0.0  ;;  %v447_v12 = vmax.f32 %v412_v6, 0.0 }
 0x148   :  { %v452_v13 = vpack.c.bf16 %v446_v11, %v442_v9  ;;  %v453_v14 = vpack.c.bf16 %v447_v12, %v443_v10 }
 0x14a   :  { %v425_v17 = vpop.f32.mrf.mxu2  ;;  %v439_v19 = vpop.f32.mrf.mxu3  ;;  %720 = vmatmul.bf16.vlgmr.msrb.gmra.mxu0 %v452_v13  ;;  %734 = vmatmul.bf16.vlgmr.msrb.gmra.mxu1 %v453_v14 }
 0x14b   :  { %v426_v20 = vadd.f32 %v425_v17, %v214_v7  ;;  %v440_v21 = vadd.f32 %v439_v19, %v215_v8 }
 0x14d   :  { %v448_v24 = vmax.f32 %v426_v20, 0.0  ;;  %v449_v25 = vmax.f32 %v440_v21, 0.0 }
 0x14f   :  { %v454_v18 = vpack.c.bf16 %v448_v24, %v444_v22  ;;  %v455_v26 = vpack.c.bf16 %v449_v25, %v445_v23 }
 0x151   :  { %748 = vmatmul.bf16.vlgmr.msrb.gmra.mxu2 %v454_v18  ;;  %762 = vmatmul.bf16.vlgmr.msrb.gmra.mxu3 %v455_v26 }
 0x1c7   :  { %v721_v28 = vpop.f32.mrf.mxu0  ;;  %v735_v29 = vpop.f32.mrf.mxu1 }
 0x1c8   :  { %v736_v30 = vadd.f32 %v735_v29, %v721_v28 }
 0x1cf   :  { %v723_v35 = vpop.f32.mrf.mxu0  ;;  %v737_v36 = vpop.f32.mrf.mxu1 }
 0x1d0   :  { %v738_v27 = vadd.f32 %v737_v36, %v723_v35 }
 0x1d4   :  { %v749_v59 = vpop.f32.mrf.mxu2  ;;  %v763_v31 = vpop.f32.mrf.mxu3 }
 0x1d5   :  { %v750_v32 = vadd.f32 %v749_v59, %v736_v30 }
 0x1d7   :  { %v764_v34 = vadd.f32 %v763_v31, %v750_v32 }
 0x1d9   :  { %v781_v37 = vadd.f32 %v1155_v33, %v764_v34 }
 0x1db   :  { %v785_v38 = vadd.f32 %v781_v37, %v1385_v0 }
 0x1dc   :  { %v751_v39 = vpop.f32.mrf.mxu2  ;;  %v765_v41 = vpop.f32.mrf.mxu3 }
 0x1dd   :  { %787 = vst [vmem:[#allocation13] sm:$0xff] %v785_v38  ;;  %v752_v40 = vadd.f32 %v751_v39, %v738_v27 }
 0x1df   :  { %v766_v42 = vadd.f32 %v765_v41, %v752_v40 }
 0x1e1   :  { %v782_v43 = vadd.f32 %v1155_v33, %v766_v42 }
 0x1e3   :  { %v786_v44 = vadd.f32 %v782_v43, %v1390_v2 }
 0x1e5   :  { %788 = vst [vmem:[#allocation13 + $0x8] sm:$0xff] %v786_v44 }
 0x1e6   :  { %801 = dma.vmem_to_hbm [thread:$0]  %s794_s8, 256, %s796_s11, [#allocation6], %s1317_s18, %s1317_s18, %s1318_s4  }
 0x1e7   :  { %1312 = dma.done.wait [#allocation6], 256  }
 0x1e8   :  { %1313 = vsyncadd [#allocation6], 4294967040 }
 0x1e9   :  { %806 = vsyncpa [#allocation5], 1 }
 0x1ea   :  { %807 = vsyncpa [#allocation8], 1 }
 0x1eb   :  { %808 = vsyncpa [#allocation11], 1 }
 0x1ec   :  { %809 = vsyncpa [#allocation6], 1 }

</bundles_post_ra>
